<compile_context>
chip_gen: v7x
topology: tpu7x:2x2x1
jax: 0.10.0
libtpu: 0.0.40
codegen_flags: <defaults>
</compile_context>

<pallas_src>
from functools import partial

import jax
import jax.numpy as jnp
from jax.experimental import pallas as pl
from jax.experimental.pallas import tpu as pltpu


def mlp_kernel(x_ref,
               w1_ref, b1_ref,
               w2_ref, b2_ref,
               w3_ref, b3_ref,
               w4_ref, b4_ref,
               o_ref):
    # x_ref: [TM, 64] f32; w*_ref: bf16; b*_ref: f32 (1, out); o_ref: [TM, 8] f32.
    x = x_ref[...].astype(jnp.bfloat16)

    h = jnp.dot(x, w1_ref[...], preferred_element_type=jnp.float32)
    h = jnp.maximum(h + b1_ref[...], 0.0)

    h = jnp.dot(h.astype(jnp.bfloat16), w2_ref[...],
                preferred_element_type=jnp.float32)
    h = jnp.maximum(h + b2_ref[...], 0.0)

    h = jnp.dot(h.astype(jnp.bfloat16), w3_ref[...],
                preferred_element_type=jnp.float32)
    h = jnp.maximum(h + b3_ref[...], 0.0)

    h = jnp.dot(h.astype(jnp.bfloat16), w4_ref[...],
                preferred_element_type=jnp.float32)
    o_ref[...] = jnp.maximum(h + b4_ref[...], 0.0).astype(o_ref.dtype)


def _round_up(n, m):
    return ((n + m - 1) // m) * m


def _batch_map(i):
    return (i, 0)


def _resident_map(i):
    return (0, 0)


def prepare_params(params):
    """One-time conversion of params: weights -> bf16 [in,out], biases -> f32 [1,out].

    Hoisted out of the hot path so mlp_forward dispatches a single pallas_call.
    """
    flat = []
    for w, b in params:
        flat.append(jnp.asarray(w, jnp.bfloat16))
        flat.append(jnp.asarray(b, jnp.float32).reshape(1, -1))
    return tuple(flat)


@partial(jax.jit, static_argnames=("tm",))
def mlp_forward(x, flat_params, *, tm=2048):
    """x: [B, 64] f32. flat_params: (W1,b1,W2,b2,W3,b3,W4,b4) from prepare_params."""
    B, d_in = x.shape
    out_dim = flat_params[-2].shape[1]

    # Batch tile: multiple of 8 sublanes, at most `tm`, and at most ceil(B/2)
    # so large batches always produce >= 2 grid steps (v7x dual-TensorCore).
    TM = min(tm, _round_up(pl.cdiv(B, 2), 8))
    grid = (pl.cdiv(B, TM),)

    in_specs = [pl.BlockSpec((TM, d_in), _batch_map)]
    for a in flat_params:
        # Full-array, VMEM-resident blocks for every weight / bias.
        in_specs.append(pl.BlockSpec(a.shape, _resident_map))

    return pl.pallas_call(
        mlp_kernel,
        out_shape=jax.ShapeDtypeStruct((B, out_dim), jnp.float32),
        grid=grid,
        in_specs=in_specs,
        out_specs=pl.BlockSpec((TM, out_dim), _batch_map),
        compiler_params=pltpu.CompilerParams(
            dimension_semantics=("parallel",),
            vmem_limit_bytes=32 * 1024 * 1024),
    )(x, *flat_params)


def init_params(key):
    """Deterministic init matching nn.Linear shapes (W stored transposed)."""
    dims = [(64, 64), (64, 32), (32, 16), (16, 8)]
    params = []
    for d_in, d_out in dims:
        kw, kb, key = jax.random.split(key, 3)
        bound = 1.0 / jnp.sqrt(d_in)  # torch default: U(-1/sqrt(in), 1/sqrt(in))
        w = jax.random.uniform(kw, (d_in, d_out), jnp.float32, -bound, bound)
        b = jax.random.uniform(kb, (1, d_out), jnp.float32, -bound, bound)
        params.append((w, b))
    return params


def reference_forward_bf16(x, params):
    """Same numerics as the kernel: bf16 MXU operands, f32 accumulation."""
    h = x.astype(jnp.float32)
    for w, b in params:
        h = jnp.dot(h.astype(jnp.bfloat16), w.astype(jnp.bfloat16),
                    preferred_element_type=jnp.float32)
        h = jnp.maximum(h + b.astype(jnp.float32), 0.0)
    return h


def reference_forward_f32(x, params):
    """Pure-f32 reference (matches the PyTorch module semantics)."""
    h = x
    for w, b in params:
        h = jnp.maximum(h @ w + b, 0.0)
    return h


if __name__ == "__main__":
    key = jax.random.PRNGKey(0)
    kx, kp = jax.random.split(key)
    params = init_params(kp)
    flat_params = prepare_params(params)

    # Small test (per-spec shape: features = 64).
    batch = 8
    x = jax.random.normal(kx, (batch, 64), jnp.float32)
    y = jax.block_until_ready(mlp_forward(x, flat_params))
    assert y.shape == (batch, 8), y.shape
    y_ref = reference_forward_bf16(x, params)
    assert jnp.allclose(y, y_ref, atol=1e-4, rtol=1e-4), "mismatch vs bf16 ref"
    y_f32 = reference_forward_f32(x, params)
    assert jnp.allclose(y, y_f32, atol=5e-2, rtol=5e-2), "mismatch vs f32 ref"

    # Larger batch: exercises the batch grid (two evenly-divided tiles).
    batch2 = 384
    x2 = jax.random.normal(kx, (batch2, 64), jnp.float32)
    y2 = jax.block_until_ready(mlp_forward(x2, flat_params))
    assert y2.shape == (batch2, 8), y2.shape
    y2_ref = reference_forward_bf16(x2, params)
    assert jnp.allclose(y2, y2_ref, atol=1e-4, rtol=1e-4), "mismatch (tiled)"

    # Ragged batch: last tile extends past B; OOB rows only feed dropped output.
    batch3 = 100
    x3 = jax.random.normal(kx, (batch3, 64), jnp.float32)
    y3 = jax.block_until_ready(mlp_forward(x3, flat_params))
    assert y3.shape == (batch3, 8), y3.shape
    y3_ref = reference_forward_bf16(x3, params)
    assert jnp.allclose(y3, y3_ref, atol=1e-4, rtol=1e-4), "mismatch (ragged)"

    print("KERNEL_OK")
</pallas_src>

<mosaic_0001>
module attributes {stable_mosaic.version = 11 : i64} {
  func.func @mlp_kernel(%arg0: i32, %arg1: memref<8x64xf32, #tpu.memory_space<vmem>>, %arg2: memref<64x64xbf16, #tpu.memory_space<vmem>>, %arg3: memref<1x64xf32, #tpu.memory_space<vmem>>, %arg4: memref<64x32xbf16, #tpu.memory_space<vmem>>, %arg5: memref<1x32xf32, #tpu.memory_space<vmem>>, %arg6: memref<32x16xbf16, #tpu.memory_space<vmem>>, %arg7: memref<1x16xf32, #tpu.memory_space<vmem>>, %arg8: memref<16x8xbf16, #tpu.memory_space<vmem>>, %arg9: memref<1x8xf32, #tpu.memory_space<vmem>>, %arg10: memref<8x8xf32, #tpu.memory_space<vmem>>) attributes {dimension_semantics = [#tpu.dimension_semantics<parallel>], iteration_bounds = array<i64: 1>, scalar_prefetch = 0 : i64, scratch_operands = 0 : i64, tpu.core_type = #tpu.core_type<tc>, window_params = [{transform_indices = @transform_0, window_bounds = array<i64: 8, 64>}, {pipeline_mode = #tpu.pipeline_mode<synchronous>, transform_indices = @transform_1, window_bounds = array<i64: 64, 64>}, {pipeline_mode = #tpu.pipeline_mode<synchronous>, transform_indices = @transform_2, window_bounds = array<i64: 1, 64>}, {pipeline_mode = #tpu.pipeline_mode<synchronous>, transform_indices = @transform_3, window_bounds = array<i64: 64, 32>}, {pipeline_mode = #tpu.pipeline_mode<synchronous>, transform_indices = @transform_4, window_bounds = array<i64: 1, 32>}, {pipeline_mode = #tpu.pipeline_mode<synchronous>, transform_indices = @transform_5, window_bounds = array<i64: 32, 16>}, {pipeline_mode = #tpu.pipeline_mode<synchronous>, transform_indices = @transform_6, window_bounds = array<i64: 1, 16>}, {pipeline_mode = #tpu.pipeline_mode<synchronous>, transform_indices = @transform_7, window_bounds = array<i64: 16, 8>}, {pipeline_mode = #tpu.pipeline_mode<synchronous>, transform_indices = @transform_8, window_bounds = array<i64: 1, 8>}, {transform_indices = @transform_9, window_bounds = array<i64: 8, 8>}]} {
    %c0 = arith.constant 0 : index
    %c0_0 = arith.constant 0 : index
    %0 = vector.load %arg1[%c0, %c0_0] : memref<8x64xf32, #tpu.memory_space<vmem>>, vector<8x64xf32>
    %1 = arith.truncf %0 : vector<8x64xf32> to vector<8x64xbf16>
    %c0_1 = arith.constant 0 : index
    %c0_2 = arith.constant 0 : index
    %2 = vector.load %arg2[%c0_1, %c0_2] : memref<64x64xbf16, #tpu.memory_space<vmem>>, vector<64x64xbf16>
    %cst = arith.constant dense<0.000000e+00> : vector<8x64xf32>
    %3 = tpu.matmul %1, %2, %cst {dimension_numbers = #tpu.dot_dimension_numbers<[1], [0], [0], [1], [0, 0, 1, 1], [], []>} : vector<8x64xbf16>, vector<64x64xbf16>, vector<8x64xf32> -> vector<8x64xf32>
    %c0_3 = arith.constant 0 : index
    %c0_4 = arith.constant 0 : index
    %4 = vector.load %arg3[%c0_3, %c0_4] : memref<1x64xf32, #tpu.memory_space<vmem>>, vector<1x64xf32>
    %5 = vector.broadcast %4 : vector<1x64xf32> to vector<8x64xf32>
    %6 = arith.addf %3, %5 : vector<8x64xf32>
    %cst_5 = arith.constant 0.000000e+00 : f32
    %7 = vector.broadcast %cst_5 : f32 to vector<8x64xf32>
    %8 = arith.maximumf %6, %7 : vector<8x64xf32>
    %9 = arith.truncf %8 : vector<8x64xf32> to vector<8x64xbf16>
    %c0_6 = arith.constant 0 : index
    %c0_7 = arith.constant 0 : index
    %10 = vector.load %arg4[%c0_6, %c0_7] : memref<64x32xbf16, #tpu.memory_space<vmem>>, vector<64x32xbf16>
    %cst_8 = arith.constant dense<0.000000e+00> : vector<8x32xf32>
    %11 = tpu.matmul %9, %10, %cst_8 {dimension_numbers = #tpu.dot_dimension_numbers<[1], [0], [0], [1], [0, 0, 1, 1], [], []>} : vector<8x64xbf16>, vector<64x32xbf16>, vector<8x32xf32> -> vector<8x32xf32>
    %c0_9 = arith.constant 0 : index
    %c0_10 = arith.constant 0 : index
    %12 = vector.load %arg5[%c0_9, %c0_10] : memref<1x32xf32, #tpu.memory_space<vmem>>, vector<1x32xf32>
    %13 = vector.broadcast %12 : vector<1x32xf32> to vector<8x32xf32>
    %14 = arith.addf %11, %13 : vector<8x32xf32>
    %cst_11 = arith.constant 0.000000e+00 : f32
    %15 = vector.broadcast %cst_11 : f32 to vector<8x32xf32>
    %16 = arith.maximumf %14, %15 : vector<8x32xf32>
    %17 = arith.truncf %16 : vector<8x32xf32> to vector<8x32xbf16>
    %c0_12 = arith.constant 0 : index
    %c0_13 = arith.constant 0 : index
    %18 = vector.load %arg6[%c0_12, %c0_13] : memref<32x16xbf16, #tpu.memory_space<vmem>>, vector<32x16xbf16>
    %cst_14 = arith.constant dense<0.000000e+00> : vector<8x16xf32>
    %19 = tpu.matmul %17, %18, %cst_14 {dimension_numbers = #tpu.dot_dimension_numbers<[1], [0], [0], [1], [0, 0, 1, 1], [], []>} : vector<8x32xbf16>, vector<32x16xbf16>, vector<8x16xf32> -> vector<8x16xf32>
    %c0_15 = arith.constant 0 : index
    %c0_16 = arith.constant 0 : index
    %20 = vector.load %arg7[%c0_15, %c0_16] : memref<1x16xf32, #tpu.memory_space<vmem>>, vector<1x16xf32>
    %21 = vector.broadcast %20 : vector<1x16xf32> to vector<8x16xf32>
    %22 = arith.addf %19, %21 : vector<8x16xf32>
    %cst_17 = arith.constant 0.000000e+00 : f32
    %23 = vector.broadcast %cst_17 : f32 to vector<8x16xf32>
    %24 = arith.maximumf %22, %23 : vector<8x16xf32>
    %25 = arith.truncf %24 : vector<8x16xf32> to vector<8x16xbf16>
    %c0_18 = arith.constant 0 : index
    %c0_19 = arith.constant 0 : index
    %26 = vector.load %arg8[%c0_18, %c0_19] : memref<16x8xbf16, #tpu.memory_space<vmem>>, vector<16x8xbf16>
    %cst_20 = arith.constant dense<0.000000e+00> : vector<8x8xf32>
    %27 = tpu.matmul %25, %26, %cst_20 {dimension_numbers = #tpu.dot_dimension_numbers<[1], [0], [0], [1], [0, 0, 1, 1], [], []>} : vector<8x16xbf16>, vector<16x8xbf16>, vector<8x8xf32> -> vector<8x8xf32>
    %c0_21 = arith.constant 0 : index
    %c0_22 = arith.constant 0 : index
    %28 = vector.load %arg9[%c0_21, %c0_22] : memref<1x8xf32, #tpu.memory_space<vmem>>, vector<1x8xf32>
    %29 = vector.broadcast %28 : vector<1x8xf32> to vector<8x8xf32>
    %30 = arith.addf %27, %29 : vector<8x8xf32>
    %cst_23 = arith.constant 0.000000e+00 : f32
    %31 = vector.broadcast %cst_23 : f32 to vector<8x8xf32>
    %32 = arith.maximumf %30, %31 : vector<8x8xf32>
    %c0_24 = arith.constant 0 : index
    %c0_25 = arith.constant 0 : index
    %33 = vector.load %arg10[%c0_24, %c0_25] : memref<8x8xf32, #tpu.memory_space<vmem>>, vector<8x8xf32>
    tpu.vector_store %arg10[%c0_24, %c0_25], %32 {strides = array<i32>} : memref<8x8xf32, #tpu.memory_space<vmem>>, vector<8x8xf32>,
    return
  }
  func.func @transform_0(%arg0: i32) -> (i32, i32) {
    %c0_i32 = arith.constant 0 : i32
    %c0_i32_0 = arith.constant 0 : i32
    return %arg0, %c0_i32 : i32, i32
  }
  func.func @transform_1(%arg0: i32) -> (i32, i32) {
    %c0_i32 = arith.constant 0 : i32
    %c0_i32_0 = arith.constant 0 : i32
    %c0_i32_1 = arith.constant 0 : i32
    return %c0_i32, %c0_i32_0 : i32, i32
  }
  func.func @transform_2(%arg0: i32) -> (i32, i32) {
    %c0_i32 = arith.constant 0 : i32
    %c0_i32_0 = arith.constant 0 : i32
    %c0_i32_1 = arith.constant 0 : i32
    return %c0_i32, %c0_i32_0 : i32, i32
  }
  func.func @transform_3(%arg0: i32) -> (i32, i32) {
    %c0_i32 = arith.constant 0 : i32
    %c0_i32_0 = arith.constant 0 : i32
    %c0_i32_1 = arith.constant 0 : i32
    return %c0_i32, %c0_i32_0 : i32, i32
  }
  func.func @transform_4(%arg0: i32) -> (i32, i32) {
    %c0_i32 = arith.constant 0 : i32
    %c0_i32_0 = arith.constant 0 : i32
    %c0_i32_1 = arith.constant 0 : i32
    return %c0_i32, %c0_i32_0 : i32, i32
  }
  func.func @transform_5(%arg0: i32) -> (i32, i32) {
    %c0_i32 = arith.constant 0 : i32
    %c0_i32_0 = arith.constant 0 : i32
    %c0_i32_1 = arith.constant 0 : i32
    return %c0_i32, %c0_i32_0 : i32, i32
  }
  func.func @transform_6(%arg0: i32) -> (i32, i32) {
    %c0_i32 = arith.constant 0 : i32
    %c0_i32_0 = arith.constant 0 : i32
    %c0_i32_1 = arith.constant 0 : i32
    return %c0_i32, %c0_i32_0 : i32, i32
  }
  func.func @transform_7(%arg0: i32) -> (i32, i32) {
    %c0_i32 = arith.constant 0 : i32
    %c0_i32_0 = arith.constant 0 : i32
    %c0_i32_1 = arith.constant 0 : i32
    return %c0_i32, %c0_i32_0 : i32, i32
  }
  func.func @transform_8(%arg0: i32) -> (i32, i32) {
    %c0_i32 = arith.constant 0 : i32
    %c0_i32_0 = arith.constant 0 : i32
    %c0_i32_1 = arith.constant 0 : i32
    return %c0_i32, %c0_i32_0 : i32, i32
  }
  func.func @transform_9(%arg0: i32) -> (i32, i32) {
    %c0_i32 = arith.constant 0 : i32
    %c0_i32_0 = arith.constant 0 : i32
    return %arg0, %c0_i32 : i32, i32
  }
}

</mosaic_0001>

<bundles_post_ra>
// kernel: mlp_forward.1
= control target key start
LH: loop header
LB: loop body
LE: loop exit
PB: predicated region body
PF: predicated region fallthrough
CT: control target
= control target key end

     0   :  { %v460_v1 = vmov 0.0   ;;  %vm461_vm0 = vmmov 0   ;;  %s579_s0 = inlined_call_operand.vmem [shape: f32[8,64], index: 0, kind: input, shape index: {}]   ;;  %s580_s1 = inlined_call_operand.vmem [shape: bf16[64,64], index: 1, kind: input, shape index: {}]   ;;  %s581_s2 = inlined_call_operand.vmem [shape: f32[1,64], index: 2, kind: input, shape index: {}]   ;;  %s582_s3 = inlined_call_operand.vmem [shape: bf16[64,32], index: 3, kind: input, shape index: {}]   ;;  %s583_s4 = inlined_call_operand.vmem [shape: f32[1,32], index: 4, kind: input, shape index: {}]   ;;  %s584_s5 = inlined_call_operand.vmem [shape: bf16[32,16], index: 5, kind: input, shape index: {}]   ;;  %s585_s6 = inlined_call_operand.vmem [shape: f32[1,16], index: 6, kind: input, shape index: {}]   ;;  %s586_s7 = inlined_call_operand.vmem [shape: bf16[16,8], index: 7, kind: input, shape index: {}]   ;;  %s587_s8 = inlined_call_operand.vmem [shape: f32[1,8], index: 8, kind: input, shape index: {}]   ;;  %s588_s9 = inlined_call_operand.hbm [shape: f32[8,8], index: 9, kind: output, shape index: {}]  }
   0x1   :  { %v425_v0 = vld [vmem:[%s580_s1] sm:$0xff]   ;;  %384 = vmatprep.subr.bf16.mxu0 %v460_v1  ;;  %396 = vmatprep.subr.bf16.mxu1 %v460_v1  ;;  %v426_v2 = vld [vmem:[%s580_s1 + $0x8] sm:$0xff]   ;;  %v427_v4 = vld [vmem:[%s580_s1 + $0x10] sm:$0xff]  }
   0x2   :  { %385 = vmatpush3.bf16.msra.mxu0 %v425_v0  ;;  %392 = vmatprep.mubr.msk.bf16.mxu0 %vm461_vm0, %v460_v1  ;;  %v429_v3 = vld [vmem:[%s582_s3] sm:$0xff]   ;;  %v430_v5 = vld [vmem:[%s582_s3 + $0x8] sm:$0xff]   ;;  %v428_v6 = vld [vmem:[%s580_s1 + $0x18] sm:$0xff]  }
   0x3   :  { %386 = vmatprep.subr.bf16.mxu0 %v460_v1  ;;  %404 = vmatprep.mubr.msk.bf16.mxu1 %vm461_vm0, %v460_v1  ;;  %v34_v7 = vld [vmem:[%s579_s0] sm:$0xff] }
   0x4   :  { %397 = vmatpush3.bf16.msra.mxu1 %v429_v3 }
   0x5   :  { %398 = vmatprep.subr.bf16.mxu1 %v460_v1 }
   0x6   :  { %387 = vmatpush3.bf16.msra.mxu0 %v426_v2 }
   0x7   :  { %388 = vmatprep.subr.bf16.mxu0 %v460_v1 }
   0xa   :  { %389 = vmatpush3.bf16.msra.mxu0 %v427_v4 }
   0xb   :  { %14 = vsyncpa [#allocation3], 0  ;;  %390 = vmatprep.subr.bf16.mxu0 %v460_v1  ;;  %399 = vmatpush3.bf16.msra.mxu1 %v430_v5  ;;  %v35_v8 = vpack.c.bf16 %v34_v7, %v34_v7  ;;  %vm75_vm1 = vcmask 523264   ;;  %v431_v9 = vld [vmem:[%s582_s3 + $0x10] sm:$0xff]   ;;  %v432_v10 = vld [vmem:[%s582_s3 + $0x18] sm:$0xff]   ;;  %vm228_vm2 = vcmask 261120  }
   0xc   :  { %400 = vmatprep.subr.bf16.mxu1 %v460_v1  ;;  %v433_v11 = vld [vmem:[%s584_s5] sm:$0xff]   ;;  %v434_v20 = vld [vmem:[%s584_s5 + $0x8] sm:$0xff]   ;;  %vm289_vm3 = vcmask 130048   ;;  %s462_s13 = smov [#allocation2]   ;;  %vm334_vm4 = vcmask 64512  }
   0xd   :  { %v350_v12 = vld [vmem:[%s581_s2] ss:$0 sm:$0xff]  ;;  %s342_s14 = sshll.u32 %s462_s13, 4  ;;  %s343_s14 = int_to_ptr.vmem [resolvable:$true] %s342_s14 }
   0xe   :  { %391 = vmatpush3.bf16.msra.mxu0 %v428_v6  ;;  %v435_v21 = vld [vmem:[%s586_s7] sm:$0xff]   ;;  %p441_p1 = scmp.lt.s32.totalorder %s343_s14, %s343_s14 }
   0xf   :  { %408 = vmatprep.subr.bf16.mxu0 %v460_v1  ;;  %401 = vmatpush3.bf16.msra.mxu1 %v431_v9  ;;  %v356_v22 = vld [vmem:[%s583_s4] ss:$0 sm:$0xff] }
  0x10   :  { %402 = vmatprep.subr.bf16.mxu1 %v460_v1  ;;  %v362_v30 = vld [vmem:[%s585_s6] ss:$0 sm:$0xff]  ;;  %s436_s6 = scalar_lea.vmem %s343_s14, 128 }
  0x11   :  { %393 = vmatmul.mubr.msk.bf16.vlgmr.msra.gmra.mrb[0].mxu0 %vm75_vm1, %v35_v8  ;;  %v366_v38 = vld [vmem:[%s587_s8] ss:$0 sm:$0xff]  ;;  %p437_p0 = scmp.ne.s32.totalorder %s343_s14, %s436_s6  ;;  %p442_p2 = scmp.lt.s32.totalorder %s436_s6, %s436_s6 }
  0x12   :  { %412 = vmatprep.mubr.msk.bf16.mxu0 %vm461_vm0, %v460_v1  ;;  %409 = vmatpush3.bf16.msra.mxu0 %v433_v11 }
  0x13   :  { %403 = vmatpush3.bf16.msra.mxu1 %v432_v10  ;;  %410 = vmatprep.subr.bf16.mxu0 %v460_v1  ;;  %p443_p3 = por %p442_p2, %p441_p1 }
  0x14   :  { %416 = vmatprep.subr.bf16.mxu1 %v460_v1 }
  0x15   :  { %p444_p4 = pnand %p443_p3, %p437_p0 }
  0x16   :  { %411 = vmatpush3.bf16.msra.mxu0 %v434_v20 }
  0xe4   :  { %v113_v13 = vpop.f32.mrb[0].mxu0 }
  0xe5   :  { %v114_v14 = vadd.f32 %v350_v12, %v113_v13  ;;  %v394_v15 = vpop.f32.mrb[1].mxu0 }
  0xe6   :  { %v116_v16 = vpop.f32.mrb[2].mxu0 }
  0xe7   :  { %v119_v17 = vmax.f32 %v114_v14, 0.0  ;;  %v395_v18 = vpop.f32.mrb[3].mxu0 }
  0xe9   :  { %v120_v19 = vpack.c.bf16 %v119_v17, %v119_v17 }
  0xeb   :  { %405 = vmatmul.mubr.msk.bf16.vlgmr.msra.gmra.mrb[0].mxu1 %vm75_vm1, %v120_v19 }
  0xec   :  { %418 = vmatprep.mubr.msk.bf16.mxu1 %vm461_vm0, %v460_v1  ;;  %417 = vmatpush3.bf16.msra.mxu1 %v435_v21 }
 0x1be   :  { %v197_v23 = vpop.f32.mrb[0].mxu1 }
 0x1bf   :  { %v198_v24 = vadd.f32 %v356_v22, %v197_v23  ;;  %v406_v25 = vpop.f32.mrb[1].mxu1 }
 0x1c0   :  { %v200_v26 = vpop.f32.mrb[2].mxu1 }
 0x1c1   :  { %v203_v27 = vmax.f32 %v198_v24, 0.0  ;;  %v407_v28 = vpop.f32.mrb[3].mxu1 }
 0x1c3   :  { %v204_v29 = vpack.c.bf16 %v203_v27, %v203_v27 }
 0x1c5   :  { %413 = vmatmul.mubr.msk.bf16.vlgmr.msra.gmra.mrb[4].mxu0 %vm228_vm2, %v204_v29 }
 0x298   :  { %v266_v31 = vpop.f32.mrb[4].mxu0 }
 0x299   :  { %v267_v32 = vadd.f32 %v362_v30, %v266_v31  ;;  %v414_v33 = vpop.f32.mrb[5].mxu0 }
 0x29a   :  { %v269_v34 = vpop.f32.mrb[6].mxu0 }
 0x29b   :  { %v272_v35 = vmax.f32 %v267_v32, 0.0  ;;  %v415_v36 = vpop.f32.mrb[7].mxu0 }
 0x29d   :  { %v273_v37 = vpack.c.bf16 %v272_v35, %v272_v35 }
 0x29f   :  { %419 = vmatmul.mubr.msk.bf16.vlgmr.msra.gmra.mrb[4].mxu1 %vm289_vm3, %v273_v37 }
 0x372   :  { %v327_v39 = vpop.f32.mrb[4].mxu1 }
 0x373   :  { %v328_v40 = vadd.f32 %v366_v38, %v327_v39  ;;  %v420_v41 = vpop.f32.mrb[5].mxu1 }
 0x374   :  { %v330_v42 = vpop.f32.mrb[6].mxu1 }
 0x375   :  { %v333_v43 = vmax.f32 %v328_v40, 0.0  ;;  %v421_v44 = vpop.f32.mrb[7].mxu1 }
 0x377   :  { %335 = vst.msk [vmem:[#allocation2] sm:$0xff] %vm334_vm4, %v333_v43 }
 0x378   :  { %447 = shalt.err (!%p444_p4)
}
 0x379   :  { %s448_s16 = scalar_lea.hbm %s588_s9, 128 }
 0x37a   :  { %p449_p5 = scmp.ne.s32.totalorder %s588_s9, %s448_s16  ;;  %p452_p6 = scmp.lt.u32.totalorder %s448_s16, %s588_s9 }
 0x37c   :  { %p454_p7 = pnand %p452_p6, %p449_p5 }
 0x37e   :  { %457 = shalt.err (!%p454_p7)
}
 0x37f   :  { %345 = dma.vmem_to_hbm [thread:$0]  %s343_s14, 128, %s588_s9, [#allocation3]  }
 0x380   :  { %458 = dma.done.wait [#allocation3], 128  }
 0x381   :  { %459 = vsyncadd [#allocation3], 4294967168 }
 0x382   :  { %349 = vsyncpa [#allocation3], 1 }

</bundles_post_ra>
